<compile_context>
chip_gen: v7x
topology: tpu7x:2x2x1
jax: 0.10.0
libtpu: 0.0.40
codegen_flags: <defaults>
</compile_context>

<pallas_src>
import functools
import math

import jax
import jax.numpy as jnp
from jax import lax
from jax.experimental import pallas as pl
from jax.experimental.pallas import tpu as pltpu


def _round_up(a: int, b: int) -> int:
    return ((a + b - 1) // b) * b


# ----------------------------------------------------------------------------
# Kernel: one (batch, q-tile, kv-tile) step of non-causal flash attention.
#   q_ref : (tq, dp)  query tile (scale already folded in, MXU-native dtype)
#   k_ref : (tk, dp)  key tile
#   v_ref : (tk, dp)  value tile
#   o_ref : (tq, dp)  output tile (written once, on the last KV step)
#   m_sc / l_sc : (tq, 1) f32 running max / running sum
#   acc_sc      : (tq, dp) f32 output accumulator
# ----------------------------------------------------------------------------
def _flash_attn_kernel(q_ref, k_ref, v_ref, o_ref, m_sc, l_sc, acc_sc, *,
                       kv_len, tk, needs_mask):
    ki = pl.program_id(2)

    @pl.when(ki == 0)
    def _init():
        m_sc[...] = jnp.full_like(m_sc, -jnp.inf)
        l_sc[...] = jnp.zeros_like(l_sc)
        acc_sc[...] = jnp.zeros_like(acc_sc)

    # NT matmul (contract last dims of both operands): no explicit K transpose is emitted.
    s = lax.dot_general(q_ref[...], k_ref[...],
                        dimension_numbers=(((1,), (1,)), ((), ())),
                        preferred_element_type=jnp.float32)

    if needs_mask:
        # Key-side padding mask: sequence was padded up to a multiple of the tile.
        kv_pos = ki * tk + lax.broadcasted_iota(jnp.int32, s.shape, 1)
        s = jnp.where(kv_pos < kv_len, s, jnp.float32(-1e30))

    # Online (streaming) softmax update — non-causal, no dropout (SelfAttention_v2).
    m_prev = m_sc[...]
    m_new = jnp.maximum(m_prev, jnp.max(s, axis=-1, keepdims=True))
    alpha = jnp.exp(m_prev - m_new)
    p = jnp.exp(s - m_new)
    l_sc[...] = alpha * l_sc[...] + jnp.sum(p, axis=-1, keepdims=True)
    acc_sc[...] = alpha * acc_sc[...] + jnp.dot(
        p.astype(v_ref.dtype), v_ref[...], preferred_element_type=jnp.float32)
    m_sc[...] = m_new

    @pl.when(ki == pl.num_programs(2) - 1)
    def _finalize():
        o_ref[...] = (acc_sc[...] *
                      pl.reciprocal(l_sc[...], approx=True)).astype(o_ref.dtype)


# Conservative per-generation scoped-VMEM budget (fits v5e/v6e/v7x without surprises).
_VMEM_BUDGET = 24 * 1024 * 1024


def _block_footprint_bytes(t, dp, op_bytes, out_bytes):
    io = 2 * (3 * op_bytes + out_bytes) * t * dp        # double-buffered q/k/v in + o out
    scratch = 4 * (t * dp + 2 * t * 128)                # f32 acc + (lane-padded) m, l
    live = 4 * 2 * t * t                                # live f32 score / prob tiles
    return io + scratch + live


def _pick_tile(S, dp, op_bytes, out_bytes):
    """Largest flash tile (capped at 256 per the spill guidance) that fits the VMEM budget
    and does not increase the padded sequence length vs. a 128 tile."""
    best, best_pad = 128, _round_up(S, 128)
    t = 256
    if _block_footprint_bytes(t, dp, op_bytes, out_bytes) <= _VMEM_BUDGET:
        s_pad = _round_up(S, t)
        if s_pad <= best_pad:
            best = t
    return best


def self_attention_v2(x, w_queries, w_keys, w_values, *, mxu_dtype=jnp.bfloat16):
    """Forward pass of SelfAttention_v2.

    x                         : (S, d_in) or (B, S, d_in)
    w_queries/w_keys/w_values : (d_out, d_in)  — raw nn.Linear weights (qkv_bias=False)
    returns                   : (S, d_out) or (B, S, d_out)
    """
    squeeze_batch = x.ndim == 2
    if squeeze_batch:
        x = x[None]
    B, S, d_in = x.shape
    d_out = w_queries.shape[0]
    out_dtype = x.dtype
    scale = 1.0 / math.sqrt(float(d_out))

    # --- QKV projection: done ONCE, outside the kernel, as a single wide matmul. ---
    # nn.Linear computes y = x @ W.T; the softmax scale is folded into Wq here.
    w_cat = jnp.concatenate(
        [jnp.transpose(w_queries) * jnp.asarray(scale, x.dtype),
         jnp.transpose(w_keys),
         jnp.transpose(w_values)], axis=-1)                       # (d_in, 3*d_out)
    qkv = jnp.dot(x, w_cat, preferred_element_type=jnp.float32).astype(x.dtype)
    q, k, v = jnp.split(qkv, 3, axis=-1)

    # bf16 MXU operands (f32 accumulation inside the kernel preserves the numerics).
    if mxu_dtype is not None and q.dtype == jnp.float32:
        q = q.astype(mxu_dtype)
        k = k.astype(mxu_dtype)
        v = v.astype(mxu_dtype)
    op_bytes = jnp.dtype(q.dtype).itemsize
    out_bytes = jnp.dtype(out_dtype).itemsize

    # --- Lane-dense / tile-aligned padding. ---
    dp = _round_up(d_out, 128)                 # dense vst (no masked partial stores)
    t = _pick_tile(S, dp, op_bytes, out_bytes)
    tq = tk = t
    S_pad = _round_up(S, t)
    needs_mask = S_pad != S
    if S_pad != S or dp != d_out:
        pad = ((0, 0), (0, S_pad - S), (0, dp - d_out))
        q = jnp.pad(q, pad)
        k = jnp.pad(k, pad)
        v = jnp.pad(v, pad)

    grid = (B, S_pad // tq, S_pad // tk)

    # VMEM limit follows the real block footprint (never clamped below it).
    fp = _block_footprint_bytes(t, dp, op_bytes, out_bytes)
    vmem_limit = int(min(max(int(1.25 * fp), 16 * 1024 * 1024), 48 * 1024 * 1024))
    vmem_limit = max(vmem_limit, int(1.1 * fp))

    # Advisory cost estimate for the in-kernel work only (projection lives in XLA now).
    flops = 2 * B * S_pad * S_pad * dp * 2          # scores + p@v
    transcendentals = B * S_pad * S_pad             # exp
    bytes_accessed = op_bytes * 3 * B * S_pad * dp + out_bytes * B * S_pad * dp

    out = pl.pallas_call(
        functools.partial(_flash_attn_kernel, kv_len=S, tk=tk, needs_mask=needs_mask),
        out_shape=jax.ShapeDtypeStruct((B, S_pad, dp), out_dtype),
        grid_spec=pltpu.PrefetchScalarGridSpec(
            num_scalar_prefetch=0,
            grid=grid,
            in_specs=[
                pl.BlockSpec((pl.Squeezed(), tq, dp), lambda b, qi, ki: (b, qi, 0)),
                pl.BlockSpec((pl.Squeezed(), tk, dp), lambda b, qi, ki: (b, ki, 0)),
                pl.BlockSpec((pl.Squeezed(), tk, dp), lambda b, qi, ki: (b, ki, 0)),
            ],
            out_specs=pl.BlockSpec((pl.Squeezed(), tq, dp),
                                   lambda b, qi, ki: (b, qi, 0)),
            scratch_shapes=[
                pltpu.VMEM((tq, 1), jnp.float32),     # running row max
                pltpu.VMEM((tq, 1), jnp.float32),     # running row sum
                pltpu.VMEM((tq, dp), jnp.float32),    # output accumulator
            ],
        ),
        compiler_params=pltpu.CompilerParams(
            dimension_semantics=("parallel", "parallel", "arbitrary"),
            vmem_limit_bytes=vmem_limit,
        ),
        cost_estimate=pl.CostEstimate(
            flops=flops,
            transcendentals=transcendentals,
            bytes_accessed=bytes_accessed,
        ),
    )(q, k, v)

    out = out[:, :S, :d_out]
    return out[0] if squeeze_batch else out


# ---------------------------------------------------------------------------
# Pure-JAX reference (mirrors the PyTorch forward exactly, in f32).
# ---------------------------------------------------------------------------
def _reference(x, w_queries, w_keys, w_values):
    q = x @ w_queries.T
    k = x @ w_keys.T
    v = x @ w_values.T
    d_k = math.sqrt(k.shape[-1])
    att = (q @ jnp.swapaxes(k, -1, -2)) / d_k
    return jax.nn.softmax(att, axis=-1) @ v


if __name__ == "__main__":
    # Small shapes consistent with the module's forward.
    B, S, d_in, d_out = 2, 8, 32, 64

    key = jax.random.PRNGKey(0)
    kx, kq, kk, kv = jax.random.split(key, 4)

    x = jax.random.normal(kx, (B, S, d_in), dtype=jnp.float32)
    w_queries = jax.random.normal(kq, (d_out, d_in), dtype=jnp.float32) * 0.1
    w_keys = jax.random.normal(kk, (d_out, d_in), dtype=jnp.float32) * 0.1
    w_values = jax.random.normal(kv, (d_out, d_in), dtype=jnp.float32) * 0.1

    fn = jax.jit(self_attention_v2)

    # Batched path (minibatch of independent sequences).
    out = fn(x, w_queries, w_keys, w_values)
    jax.block_until_ready(out)
    assert out.shape == (B, S, d_out), out.shape
    ref = _reference(x, w_queries, w_keys, w_values)
    max_err = float(jnp.max(jnp.abs(out - ref)))
    # Tolerance accounts for bf16 MXU operands + EUP approximate reciprocal.
    assert jnp.allclose(out, ref, atol=2e-2, rtol=2e-2), max_err

    # 2-D path (exactly what the PyTorch forward supports, since it uses keys.T).
    x2 = x[0]
    out2 = jax.jit(self_attention_v2)(x2, w_queries, w_keys, w_values)
    jax.block_until_ready(out2)
    assert out2.shape == (S, d_out), out2.shape
    ref2 = _reference(x2, w_queries, w_keys, w_values)
    assert jnp.allclose(out2, ref2, atol=2e-2, rtol=2e-2)

    print("KERNEL_OK")
</pallas_src>

<mosaic_0001>
module attributes {stable_mosaic.version = 11 : i64} {
  func.func @_flash_attn_kernel(%arg0: i32, %arg1: i32, %arg2: i32, %arg3: memref<1x128x128xbf16, #tpu.memory_space<vmem>>, %arg4: memref<1x128x128xbf16, #tpu.memory_space<vmem>>, %arg5: memref<1x128x128xbf16, #tpu.memory_space<vmem>>, %arg6: memref<1x128x128xf32, #tpu.memory_space<vmem>>, %arg7: memref<128x1xf32, #tpu.memory_space<vmem>>, %arg8: memref<128x1xf32, #tpu.memory_space<vmem>>, %arg9: memref<128x128xf32, #tpu.memory_space<vmem>>) attributes {dimension_semantics = [#tpu.dimension_semantics<parallel>, #tpu.dimension_semantics<parallel>, #tpu.dimension_semantics<arbitrary>], iteration_bounds = array<i64: 2, 1, 1>, scalar_prefetch = 0 : i64, scratch_operands = 3 : i64, tpu.core_type = #tpu.core_type<tc>, window_params = [{transform_indices = @transform_0, window_bounds = array<i64: 1, 128, 128>}, {transform_indices = @transform_1, window_bounds = array<i64: 1, 128, 128>}, {transform_indices = @transform_2, window_bounds = array<i64: 1, 128, 128>}, {transform_indices = @transform_3, window_bounds = array<i64: 1, 128, 128>}]} {
    %c0_i32 = arith.constant 0 : i32
    %0 = arith.cmpi eq, %arg2, %c0_i32 : i32
    %1 = arith.extui %0 : i1 to i32
    %c0_i32_0 = arith.constant 0 : i32
    %2 = arith.cmpi ne, %1, %c0_i32_0 : i32
    scf.if %2 {
      %cst_27 = arith.constant 0xFF800000 : f32
      %44 = vector.broadcast %cst_27 : f32 to vector<128x1xf32>
      %c0_28 = arith.constant 0 : index
      %c0_29 = arith.constant 0 : index
      %45 = vector.load %arg7[%c0_28, %c0_29] : memref<128x1xf32, #tpu.memory_space<vmem>>, vector<128x1xf32>
      tpu.vector_store %arg7[%c0_28, %c0_29], %44 {strides = array<i32>} : memref<128x1xf32, #tpu.memory_space<vmem>>, vector<128x1xf32>,
      %cst_30 = arith.constant 0.000000e+00 : f32
      %46 = vector.broadcast %cst_30 : f32 to vector<128x1xf32>
      %c0_31 = arith.constant 0 : index
      %c0_32 = arith.constant 0 : index
      %47 = vector.load %arg8[%c0_31, %c0_32] : memref<128x1xf32, #tpu.memory_space<vmem>>, vector<128x1xf32>
      tpu.vector_store %arg8[%c0_31, %c0_32], %46 {strides = array<i32>} : memref<128x1xf32, #tpu.memory_space<vmem>>, vector<128x1xf32>,
      %cst_33 = arith.constant 0.000000e+00 : f32
      %48 = vector.broadcast %cst_33 : f32 to vector<128x128xf32>
      %c0_34 = arith.constant 0 : index
      %c0_35 = arith.constant 0 : index
      %49 = vector.load %arg9[%c0_34, %c0_35] : memref<128x128xf32, #tpu.memory_space<vmem>>, vector<128x128xf32>
      tpu.vector_store %arg9[%c0_34, %c0_35], %48 {strides = array<i32>} : memref<128x128xf32, #tpu.memory_space<vmem>>, vector<128x128xf32>,
    } else {
    }
    %c0 = arith.constant 0 : index
    %c0_1 = arith.constant 0 : index
    %c0_2 = arith.constant 0 : index
    %3 = vector.load %arg3[%c0, %c0_1, %c0_2] : memref<1x128x128xbf16, #tpu.memory_space<vmem>>, vector<1x128x128xbf16>
    %4 = vector.shape_cast %3 : vector<1x128x128xbf16> to vector<128x128xbf16>
    %c0_3 = arith.constant 0 : index
    %c0_4 = arith.constant 0 : index
    %c0_5 = arith.constant 0 : index
    %5 = vector.load %arg4[%c0_3, %c0_4, %c0_5] : memref<1x128x128xbf16, #tpu.memory_space<vmem>>, vector<1x128x128xbf16>
    %6 = vector.shape_cast %5 : vector<1x128x128xbf16> to vector<128x128xbf16>
    %cst = arith.constant dense<0.000000e+00> : vector<128x128xf32>
    %7 = tpu.matmul %4, %6, %cst {dimension_numbers = #tpu.dot_dimension_numbers<[1], [1], [0], [0], [0, 0, 1, 0], [], []>} : vector<128x128xbf16>, vector<128x128xbf16>, vector<128x128xf32> -> vector<128x128xf32>
    %c128_i32 = arith.constant 128 : i32
    %8 = arith.muli %arg2, %c128_i32 : i32
    %9 = tpu.iota {dimensions = array<i32: 1>} : vector<128x128xi32>
    %10 = vector.broadcast %8 : i32 to vector<128x128xi32>
    %11 = arith.addi %10, %9 : vector<128x128xi32>
    %c8_i32 = arith.constant 8 : i32
    %12 = vector.broadcast %c8_i32 : i32 to vector<128x128xi32>
    %13 = arith.cmpi slt, %11, %12 : vector<128x128xi32>
    %cst_6 = arith.constant -1.000000e+30 : f32
    %14 = vector.broadcast %cst_6 : f32 to vector<128x128xf32>
    %15 = arith.select %13, %7, %14 : vector<128x128xi1>, vector<128x128xf32>
    %c0_7 = arith.constant 0 : index
    %c0_8 = arith.constant 0 : index
    %16 = vector.load %arg7[%c0_7, %c0_8] : memref<128x1xf32, #tpu.memory_space<vmem>>, vector<128x1xf32>
    %cst_9 = arith.constant dense<0xFF800000> : vector<128xf32>
    %17 = vector.multi_reduction <maximumf>, %15, %cst_9 [1] : vector<128x128xf32> to vector<128xf32>
    %18 = vector.shape_cast %17 : vector<128xf32> to vector<128x1xf32>
    %19 = arith.maximumf %16, %18 : vector<128x1xf32>
    %20 = arith.subf %16, %19 : vector<128x1xf32>
    %21 = math.exp %20 : vector<128x1xf32>
    %22 = vector.broadcast %19 : vector<128x1xf32> to vector<128x128xf32>
    %23 = arith.subf %15, %22 : vector<128x128xf32>
    %24 = math.exp %23 : vector<128x128xf32>
    %c0_10 = arith.constant 0 : index
    %c0_11 = arith.constant 0 : index
    %25 = vector.load %arg8[%c0_10, %c0_11] : memref<128x1xf32, #tpu.memory_space<vmem>>, vector<128x1xf32>
    %26 = arith.mulf %21, %25 : vector<128x1xf32>
    %cst_12 = arith.constant dense<0.000000e+00> : vector<128xf32>
    %27 = vector.multi_reduction <add>, %24, %cst_12 [1] : vector<128x128xf32> to vector<128xf32>
    %28 = vector.shape_cast %27 : vector<128xf32> to vector<128x1xf32>
    %29 = arith.addf %26, %28 : vector<128x1xf32>
    %c0_13 = arith.constant 0 : index
    %c0_14 = arith.constant 0 : index
    %30 = vector.load %arg8[%c0_13, %c0_14] : memref<128x1xf32, #tpu.memory_space<vmem>>, vector<128x1xf32>
    tpu.vector_store %arg8[%c0_13, %c0_14], %29 {strides = array<i32>} : memref<128x1xf32, #tpu.memory_space<vmem>>, vector<128x1xf32>,
    %c0_15 = arith.constant 0 : index
    %c0_16 = arith.constant 0 : index
    %31 = vector.load %arg9[%c0_15, %c0_16] : memref<128x128xf32, #tpu.memory_space<vmem>>, vector<128x128xf32>
    %32 = vector.broadcast %21 : vector<128x1xf32> to vector<128x128xf32>
    %33 = arith.mulf %32, %31 : vector<128x128xf32>
    %34 = arith.truncf %24 : vector<128x128xf32> to vector<128x128xbf16>
    %c0_17 = arith.constant 0 : index
    %c0_18 = arith.constant 0 : index
    %c0_19 = arith.constant 0 : index
    %35 = vector.load %arg5[%c0_17, %c0_18, %c0_19] : memref<1x128x128xbf16, #tpu.memory_space<vmem>>, vector<1x128x128xbf16>
    %36 = vector.shape_cast %35 : vector<1x128x128xbf16> to vector<128x128xbf16>
    %cst_20 = arith.constant dense<0.000000e+00> : vector<128x128xf32>
    %37 = tpu.matmul %34, %36, %cst_20 {dimension_numbers = #tpu.dot_dimension_numbers<[1], [0], [0], [1], [0, 0, 1, 1], [], []>} : vector<128x128xbf16>, vector<128x128xbf16>, vector<128x128xf32> -> vector<128x128xf32>
    %38 = arith.addf %33, %37 : vector<128x128xf32>
    %c0_21 = arith.constant 0 : index
    %c0_22 = arith.constant 0 : index
    %39 = vector.load %arg9[%c0_21, %c0_22] : memref<128x128xf32, #tpu.memory_space<vmem>>, vector<128x128xf32>
    tpu.vector_store %arg9[%c0_21, %c0_22], %38 {strides = array<i32>} : memref<128x128xf32, #tpu.memory_space<vmem>>, vector<128x128xf32>,
    %c0_23 = arith.constant 0 : index
    %c0_24 = arith.constant 0 : index
    %40 = vector.load %arg7[%c0_23, %c0_24] : memref<128x1xf32, #tpu.memory_space<vmem>>, vector<128x1xf32>
    tpu.vector_store %arg7[%c0_23, %c0_24], %19 {strides = array<i32>} : memref<128x1xf32, #tpu.memory_space<vmem>>, vector<128x1xf32>,
    %c0_i32_25 = arith.constant 0 : i32
    %41 = arith.cmpi eq, %arg2, %c0_i32_25 : i32
    %42 = arith.extui %41 : i1 to i32
    %c0_i32_26 = arith.constant 0 : i32
    %43 = arith.cmpi ne, %42, %c0_i32_26 : i32
    scf.if %43 {
      %c0_27 = arith.constant 0 : index
      %c0_28 = arith.constant 0 : index
      %44 = vector.load %arg9[%c0_27, %c0_28] : memref<128x128xf32, #tpu.memory_space<vmem>>, vector<128x128xf32>
      %c0_29 = arith.constant 0 : index
      %c0_30 = arith.constant 0 : index
      %45 = vector.load %arg8[%c0_29, %c0_30] : memref<128x1xf32, #tpu.memory_space<vmem>>, vector<128x1xf32>
      %46 = tpu.reciprocal %45 {approx = true} : vector<128x1xf32> -> vector<128x1xf32>
      %47 = vector.broadcast %46 : vector<128x1xf32> to vector<128x128xf32>
      %48 = arith.mulf %44, %47 : vector<128x128xf32>
      %c0_31 = arith.constant 0 : index
      %c0_32 = arith.constant 0 : index
      %c0_33 = arith.constant 0 : index
      %49 = vector.load %arg6[%c0_31, %c0_32, %c0_33] : memref<1x128x128xf32, #tpu.memory_space<vmem>>, vector<1x128x128xf32>
      %50 = vector.shape_cast %49 : vector<1x128x128xf32> to vector<128x128xf32>
      %51 = vector.shape_cast %48 : vector<128x128xf32> to vector<1x128x128xf32>
      tpu.vector_store %arg6[%c0_31, %c0_32, %c0_33], %51 {strides = array<i32>} : memref<1x128x128xf32, #tpu.memory_space<vmem>>, vector<1x128x128xf32>,
    } else {
    }
    return
  }
  func.func @transform_0(%arg0: i32, %arg1: i32, %arg2: i32) -> (i32, i32, i32) {
    %c0_i32 = arith.constant 0 : i32
    %c0_i32_0 = arith.constant 0 : i32
    return %arg0, %arg1, %c0_i32 : i32, i32, i32
  }
  func.func @transform_1(%arg0: i32, %arg1: i32, %arg2: i32) -> (i32, i32, i32) {
    %c0_i32 = arith.constant 0 : i32
    %c0_i32_0 = arith.constant 0 : i32
    return %arg0, %arg2, %c0_i32 : i32, i32, i32
  }
  func.func @transform_2(%arg0: i32, %arg1: i32, %arg2: i32) -> (i32, i32, i32) {
    %c0_i32 = arith.constant 0 : i32
    %c0_i32_0 = arith.constant 0 : i32
    return %arg0, %arg2, %c0_i32 : i32, i32, i32
  }
  func.func @transform_3(%arg0: i32, %arg1: i32, %arg2: i32) -> (i32, i32, i32) {
    %c0_i32 = arith.constant 0 : i32
    %c0_i32_0 = arith.constant 0 : i32
    return %arg0, %arg1, %c0_i32 : i32, i32, i32
  }
}

</mosaic_0001>

<bundles_post_ra>
// kernel: self_attention_v2.1
= control target key start
LH: loop header
LB: loop body
LE: loop exit
PB: predicated region body
PF: predicated region fallthrough
CT: control target
= control target key end

     0   :  { %s1880_s12 = smov 0   ;;  %s1882_s13 = smov 0   ;;  %s2402_s0 = inlined_call_operand.vmem [shape: bf16[2,128,128], index: 0, kind: input, shape index: {}]   ;;  %s2403_s1 = inlined_call_operand.vmem [shape: bf16[2,128,128], index: 1, kind: input, shape index: {}]   ;;  %s2404_s2 = inlined_call_operand.vmem [shape: bf16[2,128,128], index: 2, kind: input, shape index: {}]   ;;  %s2405_s3 = inlined_call_operand.vmem [shape: f32[2,128,128], index: 3, kind: output, shape index: {}]  }
   0x1   :  { %s1884_s14 = smov 0  }
   0x2 LB: > { %s32_s15 = sadd.s32 1, %s1851_s13  ;;  %p1549_p0 = scmp.ge.s32.totalorder %s1855_s14, 1  ;;  %s1855_s14 = sphi %s1884_s14, %s13_s14   ;;  %s1851_s13 = sphi %s1882_s13, %s2421_s13   ;;  %s1847_s12 = sphi %s1880_s12, %s2420_s12  }
   0x3   : > { %p34_p1 = scmp.ge.s32.totalorder %s32_s15, 2  ;;  %p199_p2 = scmp.lt.s32.totalorder %s1855_s14, 3 }
   0x5   : > { %s2423_s15 = smov (%p34_p1, %s32_s15), 0  ;;  %p200_p3 = pnand %p1549_p0, %p199_p2 }
   0x6   : > { %p250_p4 = scmp.lt.s32.totalorder (!%p200_p3), %s1847_s12, 1  ;;  %vm294_vm0 = vcmask (!%p200_p3), 7168   ;;  %v1857_v16 = vmov (!%p200_p3), -inf   ;;  %v569_v17 = vlaneseq (!%p200_p3)  ;;  %v1858_v37 = vmov (!%p200_p3), 0  }
   0x7   : > { %203 = sbr.rel (%p200_p3) target bundleno = 926 (0x39e), region = 32  ;;  %297 = vst.msk [vmem:[#allocation2 + $0x10] sm:$0xff] (!%p200_p3), %vm294_vm0, %v1857_v16  ;;  %295 = vst.msk [vmem:[#allocation2] sm:$0xff] (!%p200_p3), %vm294_vm0, %v1857_v16  ;;  %1712 = vset.pattern.permute.xlu1 (!%p200_p3), %v1858_v37  ;;  %1711 = vset.pattern.permute.xlu0 (!%p200_p3), %v1858_v37  ;;  %v1859_v46 = vmov (!%p200_p3), 0.0  }
   0x8   : > { %296 = vst.msk [vmem:[#allocation2 + $0x8] sm:$0xff] (!%p200_p3), %vm294_vm0, %v1857_v16  ;;  %298 = vst.msk [vmem:[#allocation2 + $0x18] sm:$0xff] (!%p200_p3), %vm294_vm0, %v1857_v16  ;;  %v1937_v18 = vand.u32 (!%p200_p3), 127, %v569_v17 }
   0x9   : > { %299 = vst.msk [vmem:[#allocation2 + $0x20] sm:$0xff] (!%p200_p3), %vm294_vm0, %v1857_v16  ;;  %300 = vst.msk [vmem:[#allocation2 + $0x28] sm:$0xff] (!%p200_p3), %vm294_vm0, %v1857_v16 }
   0xa   : > { %301 = vst.msk [vmem:[#allocation2 + $0x30] sm:$0xff] (!%p200_p3), %vm294_vm0, %v1857_v16  ;;  %302 = vst.msk [vmem:[#allocation2 + $0x38] sm:$0xff] (!%p200_p3), %vm294_vm0, %v1857_v16  ;;  %vm573_vm1 = vcmp.lt.s32.totalorder (!%p200_p3), %v1937_v18, 8 }
   0xb   : > { %303 = vst.msk [vmem:[#allocation2 + $0x40] sm:$0xff] (!%p200_p3), %vm294_vm0, %v1857_v16  ;;  %304 = vst.msk [vmem:[#allocation2 + $0x48] sm:$0xff] (!%p200_p3), %vm294_vm0, %v1857_v16 }
   0xc   : > { %305 = vst.msk [vmem:[#allocation2 + $0x50] sm:$0xff] (!%p200_p3), %vm294_vm0, %v1857_v16  ;;  %306 = vst.msk [vmem:[#allocation2 + $0x58] sm:$0xff] (!%p200_p3), %vm294_vm0, %v1857_v16 }
   0xd   : > { %307 = vst.msk [vmem:[#allocation2 + $0x60] sm:$0xff] (!%p200_p3), %vm294_vm0, %v1857_v16  ;;  %308 = vst.msk [vmem:[#allocation2 + $0x68] sm:$0xff] (!%p200_p3), %vm294_vm0, %v1857_v16 }
   0xe   : > { %s2425_s12 = smov (!%p250_p4, %s1847_s12), 1  ;;  %309 = vst.msk [vmem:[#allocation2 + $0x70] sm:$0xff] %vm294_vm0, %v1857_v16  ;;  %310 = vst.msk [vmem:[#allocation2 + $0x78] sm:$0xff] %vm294_vm0, %v1857_v16  ;;  %v2044_v55 = vld [vmem:[#allocation2 + $0x10] sm:$0xff]  ;;  %v2046_v56 = vld [vmem:[#allocation2] sm:$0xff] }
   0xf   : > { %s1901_s16 = sshll.u32 %s2425_s12, 6  ;;  %313 = vst.msk [vmem:[#allocation3 + $0x10] sm:$0xff] %vm294_vm0, %v1859_v46  ;;  %311 = vst.msk [vmem:[#allocation3] sm:$0xff] %vm294_vm0, %v1859_v46  ;;  %v2054_v61 = vld [vmem:[#allocation2 + $0x18] sm:$0xff]  ;;  %v2061_v63 = vld [vmem:[#allocation2 + $0x8] sm:$0xff]  ;;  %s1587_s26 = sshll.u32 %s2425_s12, 7 }
  0x10   : > { %s267_s19 = scalar_lea.vmem %s2403_s1, %s1901_s16  ;;  %s1911_s22 = scalar_lea.vmem %s2402_s0, %s1901_s16  ;;  %312 = vst.msk [vmem:[#allocation3 + $0x8] sm:$0xff] %vm294_vm0, %v1859_v46  ;;  %314 = vst.msk [vmem:[#allocation3 + $0x18] sm:$0xff] %vm294_vm0, %v1859_v46  ;;  %v2103_v18 = vld [vmem:[#allocation2 + $0x28] sm:$0xff] }
  0x11   : > { %v1713_v0 = vld [vmem:[%s267_s19] sm:$0xff]   ;;  %v1714_v1 = vld [vmem:[%s267_s19 + $0x8] sm:$0xff]   ;;  %v1715_v2 = vld [vmem:[%s267_s19 + $0x10] sm:$0xff]   ;;  %315 = vst.msk [vmem:[#allocation3 + $0x20] sm:$0xff] %vm294_vm0, %v1859_v46  ;;  %s2040_s25 = scalar_lea.vmem %s2404_s2, %s1901_s16  ;;  %s2362_s29 = scalar_lea.vmem %s2405_s3, %s1587_s26 }
  0x12   : > { %1620 = vmatprep.subr.bf16.mxu0 %v1713_v0  ;;  %v1721_v3 = vld [vmem:[%s1911_s22] sm:$0xff]   ;;  %v1716_v4 = vld [vmem:[%s267_s19 + $0x18] sm:$0xff]   ;;  %v1718_v6 = vld [vmem:[%s267_s19 + $0x28] sm:$0xff]   ;;  %316 = vst.msk [vmem:[#allocation3 + $0x28] sm:$0xff] %vm294_vm0, %v1859_v46 }
  0x13   : > { %1621 = vmatpush3.bf16.xpose.msra.mxu0 %v1713_v0  ;;  %1636 = vmatprep.mubr.bf16.mxu0 %v1721_v3  ;;  %v1717_v5 = vld [vmem:[%s267_s19 + $0x20] sm:$0xff]   ;;  %v1719_v7 = vld [vmem:[%s267_s19 + $0x30] sm:$0xff]   ;;  %v1720_v8 = vld [vmem:[%s267_s19 + $0x38] sm:$0xff]   ;;  %317 = vst.msk [vmem:[#allocation3 + $0x30] sm:$0xff] %vm294_vm0, %v1859_v46 }
  0x14   : > { %1622 = vmatprep.subr.bf16.mxu0 %v1714_v1  ;;  %v1722_v9 = vld [vmem:[%s1911_s22 + $0x8] sm:$0xff]   ;;  %v1723_v10 = vld [vmem:[%s1911_s22 + $0x10] sm:$0xff]   ;;  %v1724_v11 = vld [vmem:[%s1911_s22 + $0x18] sm:$0xff]   ;;  %318 = vst.msk [vmem:[#allocation3 + $0x38] sm:$0xff] %vm294_vm0, %v1859_v46 }
  0x15   : > { %v1725_v12 = vld [vmem:[%s1911_s22 + $0x20] sm:$0xff]   ;;  %v1726_v13 = vld [vmem:[%s1911_s22 + $0x28] sm:$0xff]   ;;  %v1727_v14 = vld [vmem:[%s1911_s22 + $0x30] sm:$0xff]   ;;  %319 = vst.msk [vmem:[#allocation3 + $0x40] sm:$0xff] %vm294_vm0, %v1859_v46 }
  0x16   : > { %v1728_v15 = vld [vmem:[%s1911_s22 + $0x38] sm:$0xff]   ;;  %320 = vst.msk [vmem:[#allocation3 + $0x48] sm:$0xff] %vm294_vm0, %v1859_v46  ;;  %321 = vst.msk [vmem:[#allocation3 + $0x50] sm:$0xff] %vm294_vm0, %v1859_v46  ;;  %v1729_v53 = vld [vmem:[%s2040_s25] sm:$0xff]  }
  0x17   : > { %322 = vst.msk [vmem:[#allocation3 + $0x58] sm:$0xff] %vm294_vm0, %v1859_v46  ;;  %323 = vst.msk [vmem:[#allocation3 + $0x60] sm:$0xff] %vm294_vm0, %v1859_v46  ;;  %v1730_v54 = vld [vmem:[%s2040_s25 + $0x8] sm:$0xff]   ;;  %1652 = vmatprep.subr.bf16.mxu1 %v1729_v53  ;;  %v1731_v0 = vld [vmem:[%s2040_s25 + $0x10] sm:$0xff]  }
  0x18   : > { %324 = vst.msk [vmem:[#allocation3 + $0x68] sm:$0xff] %vm294_vm0, %v1859_v46  ;;  %325 = vst.msk [vmem:[#allocation3 + $0x70] sm:$0xff] %vm294_vm0, %v1859_v46  ;;  %1653 = vmatpush3.bf16.msra.mxu1 %v1729_v53  ;;  %v1733_v16 = vld [vmem:[%s2040_s25 + $0x20] sm:$0xff]  }
  0x19   : > { %326 = vst.msk [vmem:[#allocation3 + $0x78] sm:$0xff] %vm294_vm0, %v1859_v46  ;;  %1654 = vmatprep.subr.bf16.mxu1 %v1730_v54  ;;  %v1735_v46 = vld [vmem:[%s2040_s25 + $0x30] sm:$0xff]  }
  0x1b   : > { %1623 = vmatpush3.bf16.xpose.msra.mxu0 %v1714_v1 }
  0x1c   : > { %1624 = vmatprep.subr.bf16.mxu0 %v1715_v2  ;;  %1655 = vmatpush3.bf16.msra.mxu1 %v1730_v54 }
  0x1d   : > { %1656 = vmatprep.subr.bf16.mxu1 %v1731_v0 }
  0x20   : > { %1657 = vmatpush3.bf16.msra.mxu1 %v1731_v0 }
  0x23   : > { %1625 = vmatpush3.bf16.xpose.msra.mxu0 %v1715_v2 }
  0x24   : > { %1626 = vmatprep.subr.bf16.mxu0 %v1716_v4 }
  0x2b   : > { %1627 = vmatpush3.bf16.xpose.msra.mxu0 %v1716_v4 }
  0x2c   : > { %1628 = vmatprep.subr.bf16.mxu0 %v1717_v5 }
  0x33   : > { %1629 = vmatpush3.bf16.xpose.msra.mxu0 %v1717_v5 }
  0x34   : > { %1630 = vmatprep.subr.bf16.mxu0 %v1718_v6 }
  0x3b   : > { %1631 = vmatpush3.bf16.xpose.msra.mxu0 %v1718_v6 }
  0x3c   : > { %1632 = vmatprep.subr.bf16.mxu0 %v1719_v7 }
  0x43   : > { %1633 = vmatpush3.bf16.xpose.msra.mxu0 %v1719_v7  ;;  %v2080_v7 = vld [vmem:[#allocation2 + $0x20] sm:$0xff] }
  0x44   : > { %1634 = vmatprep.subr.bf16.mxu0 %v1720_v8 }
  0x4b   : > { %1635 = vmatpush3.bf16.xpose.msra.mxu0 %v1720_v8  ;;  %v1732_v8 = vld [vmem:[%s2040_s25 + $0x18] sm:$0xff]  }
  0x4c   : > { %1658 = vmatprep.subr.bf16.mxu1 %v1732_v8 }
  0x4d   : > { %1659 = vmatpush3.bf16.msra.mxu1 %v1732_v8 }
  0x4e   : > { %1660 = vmatprep.subr.bf16.mxu1 %v1733_v16 }
  0x51   : > { %1661 = vmatpush3.bf16.msra.mxu1 %v1733_v16 }
  0x52   : > { %1637 = vmatmul.mubr.bf16.vlgmr.msra.gmra.mrb[0].mxu0 %v1722_v9 }
  0x53   : > { %1640 = vmatprep.mubr.bf16.mxu0 %v1723_v10  ;;  %v2087_v10 = vld [vmem:[#allocation2 + $0x38] sm:$0xff] }
  0x5a   : > { %1641 = vmatmul.mubr.bf16.gmra.mrb[4].mxu0 %v1724_v11 }
  0x5b   : > { %1644 = vmatprep.mubr.bf16.mxu0 %v1725_v12 }
  0x62   : > { %1645 = vmatmul.mubr.bf16.gmra.mrb[8].mxu0 %v1726_v13 }
  0x63   : > { %1648 = vmatprep.mubr.bf16.mxu0 %v1727_v14 }
  0x6a   : > { %1649 = vmatmul.mubr.bf16.gmra.mrb[12].mxu0 %v1728_v15  ;;  %v2096_v15 = vld [vmem:[#allocation2 + $0x30] sm:$0xff] }
 0x125   : > { %v1638_v19 = vpop.f32.mrb[0].mxu0 }
 0x126   : > { %v505_v20 = vpop.f32.mrb[1].mxu0  ;;  %v1942_v21 = vsel %vm573_vm1, %v1638_v19, -1e+30 }
 0x127   : > { %610 = vmax.xlane.f32.xlu1 %v1942_v21  ;;  %v1639_v22 = vpop.f32.mrb[2].mxu0  ;;  %v1947_v23 = vsel %vm573_vm1, %v505_v20, -1e+30 }
 0x128   : > { %606 = vmax.xlane.f32.xlu0 %v1947_v23  ;;  %v508_v24 = vpop.f32.mrb[3].mxu0  ;;  %v1952_v25 = vsel %vm573_vm1, %v1639_v22, -1e+30 }
 0x129   : > { %v1957_v26 = vsel %vm573_vm1, %v508_v24, -1e+30 }
 0x12b   : > { %612 = vmax.xlane.f32.xlu1 %v1952_v25 }
 0x12c   : > { %608 = vmax.xlane.f32.xlu0 %v1957_v26 }
 0x12d   : > { %v1642_v27 = vpop.f32.mrb[4].mxu0 }
 0x12e   : > { %v521_v28 = vpop.f32.mrb[5].mxu0  ;;  %v1972_v33 = vsel %vm573_vm1, %v1642_v27, -1e+30 }
 0x12f   : > { %v1643_v29 = vpop.f32.mrb[6].mxu0  ;;  %v1962_v30 = vsel %vm573_vm1, %v521_v28, -1e+30  ;;  %v2115_v28 = vld [vmem:[#allocation2 + $0x40] sm:$0xff] }
 0x130   : > { %614 = vmax.xlane.f32.xlu0 %v1962_v30  ;;  %v524_v31 = vpop.f32.mrb[7].mxu0  ;;  %v1967_v32 = vsel %vm573_vm1, %v1643_v29, -1e+30  ;;  %v1734_v29 = vld [vmem:[%s2040_s25 + $0x28] sm:$0xff]  }
 0x131   : > { %620 = vmax.xlane.f32.xlu1 %v1967_v32  ;;  %v1977_v34 = vsel %vm573_vm1, %v524_v31, -1e+30  ;;  %1662 = vmatprep.subr.bf16.mxu1 %v1734_v29 }
 0x132   : > { %1663 = vmatpush3.bf16.msra.mxu1 %v1734_v29 }
 0x133   : > { %1664 = vmatprep.subr.bf16.mxu1 %v1735_v46 }
 0x134   : > { %618 = vmax.xlane.f32.xlu0 %v1972_v33 }
 0x135   : > { %616 = vmax.xlane.f32.xlu1 %v1977_v34  ;;  %v1646_v35 = vpop.f32.mrb[8].mxu0 }
 0x136   : > { %v537_v36 = vpop.f32.mrb[9].mxu0  ;;  %v1992_v42 = vsel %vm573_vm1, %v1646_v35, -1e+30  ;;  %v2123_v35 = vld [vmem:[#allocation2 + $0x58] sm:$0xff]  ;;  %1665 = vmatpush3.bf16.msra.mxu1 %v1735_v46  ;;  %v2183_v46 = vld [vmem:[#allocation2 + $0x68] sm:$0xff] }
 0x137   : > { %v1647_v38 = vpop.f32.mrb[10].mxu0  ;;  %v1982_v39 = vsel %vm573_vm1, %v537_v36, -1e+30 }
 0x138   : > { %v1986_v40 = vsel %vm573_vm1, %v1647_v38, -1e+30  ;;  %622 = vmax.xlane.f32.xlu0 %v1982_v39  ;;  %v540_v41 = vpop.f32.mrb[11].mxu0 }
 0x139   : > { %628 = vmax.xlane.f32.xlu1 %v1986_v40  ;;  %v1996_v43 = vsel %vm573_vm1, %v540_v41, -1e+30 }
 0x13c   : > { %626 = vmax.xlane.f32.xlu0 %v1992_v42 }
 0x13d   : > { %624 = vmax.xlane.f32.xlu1 %v1996_v43  ;;  %v1650_v44 = vpop.f32.mrb[12].mxu0 }
 0x13e   : > { %v553_v45 = vpop.f32.mrb[13].mxu0  ;;  %v2028_v51 = vsel %vm573_vm1, %v1650_v44, -1e+30 }
 0x13f   : > { %v1651_v47 = vpop.f32.mrb[14].mxu0  ;;  %v2018_v48 = vsel %vm573_vm1, %v553_v45, -1e+30  ;;  %v2135_v45 = vld [vmem:[#allocation2 + $0x50] sm:$0xff] }
 0x140   : > { %v2022_v49 = vsel %vm573_vm1, %v1651_v47, -1e+30  ;;  %630 = vmax.xlane.f32.xlu0 %v2018_v48  ;;  %v556_v50 = vpop.f32.mrb[15].mxu0 }
 0x141   : > { %636 = vmax.xlane.f32.xlu1 %v2022_v49  ;;  %v2032_v52 = vsel %vm573_vm1, %v556_v50, -1e+30  ;;  %v2143_v50 = vld [vmem:[#allocation2 + $0x48] sm:$0xff] }
 0x144   : > { %634 = vmax.xlane.f32.xlu0 %v2028_v51 }
 0x145   : > { %632 = vmax.xlane.f32.xlu1 %v2032_v52 }
 0x1b4   : > { %v611_v57 = vpop.xlane.xlu1 %610 }
 0x1b5   : > { %v2049_v58 = vmax.f32 %v2044_v55, %v611_v57  ;;  %v607_v59 = vpop.xlane.xlu0 %606 }
 0x1b6   : > { %v2052_v60 = vmax.f32 %v2046_v56, %v607_v59 }
 0x1b7   : > { %v656_v62 = vsub.f32 %v2044_v55, %v2049_v58  ;;  %1242 = vst.msk [vmem:[#allocation2 + $0x10] sm:$0xff] %vm294_vm0, %v2049_v58  ;;  %714 = vperm.xlu1 %1712, %v2049_v58  }
 0x1b8   : > { %1240 = vst.msk [vmem:[#allocation2] sm:$0xff] %vm294_vm0, %v2052_v60  ;;  %v613_v2 = vpop.xlane.xlu1 %612  ;;  %704 = vperm.xlu0 %1711, %v2052_v60  }
 0x1b9   : > { %v2070_v3 = vmax.f32 %v2054_v61, %v613_v2  ;;  %v609_v4 = vpop.xlane.xlu0 %608  ;;  %v2155_v2 = vld [vmem:[#allocation2 + $0x60] sm:$0xff] }
 0x1ba   : > { %v2073_v5 = vmax.f32 %v2061_v63, %v609_v4  ;;  %v1736_v4 = vld [vmem:[%s2040_s25 + $0x38] sm:$0xff]  }
 0x1bb   : > { %1243 = vst.msk [vmem:[#allocation2 + $0x18] sm:$0xff] %vm294_vm0, %v2070_v3  ;;  %719 = vperm.xlu1 %1712, %v2070_v3   ;;  %1666 = vmatprep.subr.bf16.mxu1 %v1736_v4 }
 0x1bc   : > { %v655_v9 = vsub.f32 %v2061_v63, %v2073_v5  ;;  %1241 = vst.msk [vmem:[#allocation2 + $0x8] sm:$0xff] %vm294_vm0, %v2073_v5  ;;  %1667 = vmatpush3.bf16.msra.mxu1 %v1736_v4 }
 0x1bd   : > { %v615_v11 = vpop.xlane.xlu0 %614 }
 0x1be   : > { %v2090_v12 = vmax.f32 %v2080_v7, %v615_v11  ;;  %v621_v13 = vpop.xlane.xlu1 %620  ;;  %v2163_v11 = vld [vmem:[#allocation2 + $0x78] sm:$0xff] }
 0x1bf   : > { %v2093_v14 = vmax.f32 %v2087_v10, %v621_v13  ;;  %709 = vperm.xlu1 %1712, %v2073_v5  }
 0x1c0   : > { %1244 = vst.msk [vmem:[#allocation2 + $0x20] sm:$0xff] %vm294_vm0, %v2090_v12 }
 0x1c1   : > { %1247 = vst.msk [vmem:[#allocation2 + $0x38] sm:$0xff] %vm294_vm0, %v2093_v14  ;;  %v619_v20 = vpop.xlane.xlu0 %618 }
 0x1c2   : > { %v2110_v22 = vmax.f32 %v2096_v15, %v619_v20  ;;  %v617_v24 = vpop.xlane.xlu1 %616 }
 0x1c3   : > { %v2113_v27 = vmax.f32 %v2103_v18, %v617_v24 }
 0x1c4   : > { %1246 = vst.msk [vmem:[#allocation2 + $0x30] sm:$0xff] %vm294_vm0, %v2110_v22  ;;  %734 = vperm.xlu1 %1712, %v2110_v22   ;;  %v2409_v55 = vsub.f32 %v2096_v15, %v2110_v22 }
 0x1c5   : > { %1245 = vst.msk [vmem:[#allocation2 + $0x28] sm:$0xff] %vm294_vm0, %v2113_v27  ;;  %v623_v37 = vpop.xlane.xlu0 %622 }
 0x1c6   : > { %v629_v38 = vpop.xlane.xlu1 %628  ;;  %v2130_v41 = vmax.f32 %v2115_v28, %v623_v37  ;;  %v2176_v37 = vld [vmem:[#allocation2 + $0x70] sm:$0xff]  ;;  %v682_v58 = vmul.f32 1.442695, %v2409_v55 }
 0x1c7   : > { %v2133_v44 = vmax.f32 %v2123_v35, %v629_v38 }
 0x1c8   : > { %1248 = vst.msk [vmem:[#allocation2 + $0x40] sm:$0xff] %vm294_vm0, %v2130_v41  ;;  %724 = vperm.xlu1 %1712, %v2090_v12   ;;  %v2411_v5 = vsub.f32 %v2115_v28, %v2130_v41 }
 0x1c9   : > { %1251 = vst.msk [vmem:[#allocation2 + $0x58] sm:$0xff] %vm294_vm0, %v2133_v44  ;;  %v627_v54 = vpop.xlane.xlu0 %626 }
 0x1ca   : > { %v625_v57 = vpop.xlane.xlu1 %624  ;;  %v2150_v59 = vmax.f32 %v2135_v45, %v627_v54 }
 0x1cb   : > { %v2153_v0 = vmax.f32 %v2143_v50, %v625_v57 }
 0x1cc   : > { %1250 = vst.msk [vmem:[#allocation2 + $0x50] sm:$0xff] %vm294_vm0, %v2150_v59  ;;  %729 = vperm.xlu1 %1712, %v2113_v27   ;;  %v2413_v15 = vsub.f32 %v2135_v45, %v2150_v59  ;;  %v2416_v45 = vsub.f32 %v2123_v35, %v2133_v44 }
 0x1cd   : > { %1249 = vst.msk [vmem:[#allocation2 + $0x48] sm:$0xff] %vm294_vm0, %v2153_v0  ;;  %749 = vperm.xlu0 %1711, %v2153_v0   ;;  %v631_v16 = vpop.xlane.xlu0 %630  ;;  %v2414_v22 = vsub.f32 %v2143_v50, %v2153_v0 }
 0x1ce   : > { %v637_v20 = vpop.xlane.xlu1 %636  ;;  %v2171_v24 = vmax.f32 %v2155_v2, %v631_v16 }
 0x1cf   : > { %v2174_v29 = vmax.f32 %v2163_v11, %v637_v20 }
 0x1d0   : > { %1252 = vst.msk [vmem:[#allocation2 + $0x60] sm:$0xff] %vm294_vm0, %v2171_v24  ;;  %739 = vperm.xlu1 %1712, %v2093_v14  }
 0x1d1   : > { %1255 = vst.msk [vmem:[#allocation2 + $0x78] sm:$0xff] %vm294_vm0, %v2174_v29  ;;  %759 = vperm.xlu0 %1711, %v2133_v44   ;;  %v635_v57 = vpop.xlane.xlu0 %634  ;;  %v2419_v44 = vsub.f32 %v2163_v11, %v2174_v29 }
 0x1d2   : > { %v633_v4 = vpop.xlane.xlu1 %632  ;;  %v2191_v16 = vmax.f32 %v2176_v37, %v635_v57 }
 0x1d3   : > { %v2194_v20 = vmax.f32 %v2183_v46, %v633_v4 }
 0x1d4   : > { %1254 = vst.msk [vmem:[#allocation2 + $0x70] sm:$0xff] %vm294_vm0, %v2191_v16  ;;  %744 = vperm.xlu1 %1712, %v2130_v41   ;;  %v2417_v50 = vsub.f32 %v2176_v37, %v2191_v16  ;;  %v700_v37 = vmul.f32 1.442695, %v2419_v44 }
 0x1d5   : > { %1253 = vst.msk [vmem:[#allocation2 + $0x68] sm:$0xff] %vm294_vm0, %v2194_v20  ;;  %769 = vperm.xlu0 %1711, %v2194_v20  }
 0x1d6   : > { %v698_v0 = vmul.f32 1.442695, %v2417_v50  ;;  %v838_v50 = vld [vmem:[#allocation3 + $0x40] sm:$0xff] }
 0x1d8   : > { %754 = vperm.xlu1 %1712, %v2150_v59   ;;  %v692_v59 = vmul.f32 1.442695, %v2416_v45 }
 0x1d9   : > { %779 = vperm.xlu0 %1711, %v2174_v29  }
 0x1dc   : > { %764 = vperm.xlu1 %1712, %v2171_v24  }
 0x1e0   : > { %774 = vperm.xlu1 %1712, %v2191_v16  }
 0x236   : > { %v715_v57 = vpop.permute.xlu1 %714 }
 0x237   : > { %v784_v4 = vsub.f32 %v1942_v21, %v715_v57  ;;  %v705_v53 = vpop.permute.xlu0 %704 }
 0x238   : > { %v782_v38 = vsub.f32 %v1947_v23, %v705_v53 }
 0x239   : > { %v802_v54 = vmul.f32 1.442695, %v784_v4 }
 0x23a   : > { %v798_v13 = vmul.f32 1.442695, %v782_v38  ;;  %v720_v8 = vpop.permute.xlu1 %719 }
 0x23b   : > { %1737 = vpow2.f32 %v802_v54  ;;  %v785_v19 = vsub.f32 %v1952_v25, %v720_v8 }
 0x23c   : > { %1739 = vpow2.f32 %v798_v13 }
 0x23d   : > { %v804_v47 = vmul.f32 1.442695, %v785_v19 }
 0x23e   : > { %v710_v36 = vpop.permute.xlu1 %709 }
 0x23f   : > { %1741 = vpow2.f32 %v804_v47  ;;  %v783_v31 = vsub.f32 %v1957_v26, %v710_v36 }
 0x241   : > { %v800_v6 = vmul.f32 1.442695, %v783_v31 }
 0x243   : > { %1743 = vpow2.f32 %v800_v6  ;;  %v735_v17 = vpop.permute.xlu1 %734 }
 0x244   : > { %v788_v21 = vsub.f32 %v1972_v33, %v735_v17 }
 0x245   : > { %v1738_v57 = vpop.eup %1737 }
 0x246   : > { %v1740_v1 = vpop.eup %1739  ;;  %v810_v23 = vmul.f32 1.442695, %v788_v21  ;;  %866 = vadd.xlane.f32.xlu0 %v1738_v57 }
 0x247   : > { %862 = vadd.xlane.f32.xlu1 %v1740_v1  ;;  %v725_v53 = vpop.permute.xlu1 %724 }
 0x248   : > { %1745 = vpow2.f32 %v810_v23  ;;  %v786_v25 = vsub.f32 %v1962_v30, %v725_v53 }
 0x249   : > { %v1742_v8 = vpop.eup %1741 }
 0x24a   : > { %v806_v19 = vmul.f32 1.442695, %v786_v25  ;;  %v1040_v38 = vpack.c.bf16 %v1742_v8, %v1738_v57 }
 0x24b   : > { %868 = vadd.xlane.f32.xlu1 %v1742_v8  ;;  %v730_v47 = vpop.permute.xlu1 %729 }
 0x24c   : > { %1747 = vpow2.f32 %v806_v19  ;;  %v787_v26 = vsub.f32 %v1977_v34, %v730_v47  ;;  %v750_v6 = vpop.permute.xlu0 %749 }
 0x24d   : > { %v1744_v31 = vpop.eup %1743  ;;  %v791_v17 = vsub.f32 %v1996_v43, %v750_v6 }
 0x24e   : > { %v808_v36 = vmul.f32 1.442695, %v787_v26  ;;  %864 = vadd.xlane.f32.xlu0 %v1744_v31  ;;  %v1039_v33 = vpack.c.bf16 %v1744_v31, %v1740_v1 }
 0x24f   : > { %v740_v13 = vpop.permute.xlu1 %739  ;;  %v816_v23 = vmul.f32 1.442695, %v791_v17 }
 0x250   : > { %1749 = vpow2.f32 %v808_v36  ;;  %v789_v54 = vsub.f32 %v1967_v32, %v740_v13  ;;  %v760_v30 = vpop.permute.xlu0 %759  ;;  %1668 = vmatprep.mubr.bf16.mxu1 %v1039_v33 }
 0x251   : > { %1669 = vmatmul.mubr.bf16.vlgmr.msra.gmra.mrb[0].mxu1 %v1040_v38  ;;  %v793_v34 = vsub.f32 %v1986_v40, %v760_v30 }
 0x252   : > { %v1746_v4 = vpop.eup %1745  ;;  %v812_v21 = vmul.f32 1.442695, %v789_v54 }
 0x253   : > { %874 = vadd.xlane.f32.xlu0 %v1746_v4  ;;  %v745_v53 = vpop.permute.xlu1 %744  ;;  %v820_v57 = vmul.f32 1.442695, %v793_v34 }
 0x254   : > { %1751 = vpow2.f32 %v812_v21  ;;  %v790_v1 = vsub.f32 %v1982_v39, %v745_v53  ;;  %v770_v25 = vpop.permute.xlu0 %769 }
 0x255   : > { %1753 = vpow2.f32 %v816_v23  ;;  %v795_v32 = vsub.f32 %v2032_v52, %v770_v25 }
 0x256   : > { %v1748_v43 = vpop.eup %1747  ;;  %v814_v19 = vmul.f32 1.442695, %v790_v1 }
 0x257   : > { %870 = vadd.xlane.f32.xlu0 %v1748_v43  ;;  %v755_v8 = vpop.permute.xlu1 %754  ;;  %v824_v31 = vmul.f32 1.442695, %v795_v32  ;;  %v672_v32 = vmul.f32 1.442695, %v655_v9 }
 0x258   : > { %1755 = vpow2.f32 %v814_v19  ;;  %v792_v47 = vsub.f32 %v1992_v42, %v755_v8  ;;  %v780_v26 = vpop.permute.xlu0 %779  ;;  %v674_v8 = vmul.f32 1.442695, %v656_v62 }
 0x259   : > { %1757 = vpow2.f32 %v820_v57  ;;  %v797_v36 = vsub.f32 %v2022_v49, %v780_v26 }
 0x25a   : > { %v1750_v6 = vpop.eup %1749  ;;  %v818_v40 = vmul.f32 1.442695, %v792_v47  ;;  %v2406_v47 = vsub.f32 %v2046_v56, %v2052_v60  ;;  %v2410_v56 = vsub.f32 %v2103_v18, %v2113_v27  ;;  %v690_v18 = vmul.f32 1.442695, %v2413_v15 }
 0x25b   : > { %v765_v39 = vpop.permute.xlu1 %764  ;;  %v1041_v33 = vpack.c.bf16 %v1750_v6, %v1748_v43  ;;  %v828_v38 = vmul.f32 1.442695, %v797_v36  ;;  %v688_v27 = vmul.f32 1.442695, %v2414_v22 }
 0x25c   : > { %1759 = vpow2.f32 %v818_v40  ;;  %v794_v17 = vsub.f32 %v2018_v48, %v765_v39  ;;  %v670_v26 = vmul.f32 1.442695, %v2406_v47  ;;  %v680_v60 = vmul.f32 1.442695, %v2410_v56 }
 0x25d   : > { %1672 = vmatprep.mubr.bf16.mxu1 %v1041_v33  ;;  %1761 = vpow2.f32 %v824_v31  ;;  %v2408_v31 = vsub.f32 %v2054_v61, %v2070_v3  ;;  %v686_v61 = vmul.f32 1.442695, %v2411_v5  ;;  %v2412_v3 = vsub.f32 %v2087_v10, %v2093_v14 }
 0x25e   : > { %v1752_v13 = vpop.eup %1751  ;;  %v822_v52 = vmul.f32 1.442695, %v794_v17  ;;  %v2415_v10 = vsub.f32 %v2155_v2, %v2171_v24  ;;  %v2418_v2 = vsub.f32 %v2183_v46, %v2194_v20 }
 0x25f   : > { %876 = vadd.xlane.f32.xlu1 %v1752_v13  ;;  %v775_v54 = vpop.permute.xlu1 %774  ;;  %v1042_v42 = vpack.c.bf16 %v1752_v13, %v1746_v4  ;;  %v1754_v21 = vpop.eup %1753  ;;  %v676_v63 = vmul.f32 1.442695, %v2408_v31 }
 0x260   : > { %1763 = vpow2.f32 %v822_v52  ;;  %v796_v30 = vsub.f32 %v2028_v51, %v775_v54  ;;  %v694_v14 = vmul.f32 1.442695, %v2415_v10  ;;  %v696_v24 = vmul.f32 1.442695, %v2418_v2  ;;  %v832_v52 = vld [vmem:[#allocation3 + $0x10] sm:$0xff] }
 0x261   : > { %1673 = vmatmul.mubr.bf16.gmra.mrb[4].mxu1 %v1042_v42  ;;  %1765 = vpow2.f32 %v828_v38  ;;  %v830_v38 = vld [vmem:[#allocation3] sm:$0xff] }
 0x262   : > { %v1756_v23 = vpop.eup %1755  ;;  %v826_v49 = vmul.f32 1.442695, %v796_v30 }
 0x263   : > { %872 = vadd.xlane.f32.xlu1 %v1750_v6  ;;  %v1043_v34 = vpack.c.bf16 %v1754_v21, %v1756_v23  ;;  %v1758_v48 = vpop.eup %1757  ;;  %v2407_v6 = vsub.f32 %v2080_v7, %v2090_v12  ;;  %v684_v7 = vmul.f32 1.442695, %v2412_v3 }
 0x264   : > { %1767 = vpow2.f32 %v826_v49  ;;  %v833_v49 = vld [vmem:[#allocation3 + $0x18] sm:$0xff] }
 0x265   : > { %1676 = vmatprep.mubr.bf16.mxu1 %v1043_v34  ;;  %1769 = vpow2.f32 %v672_v32  ;;  %v678_v40 = vmul.f32 1.442695, %v2407_v6 }
 0x266   : > { %v1760_v53 = vpop.eup %1759  ;;  %1771 = vpow2.f32 %v674_v8 }
 0x267   : > { %884 = vadd.xlane.f32.xlu1 %v1758_v48  ;;  %882 = vadd.xlane.f32.xlu0 %v1760_v53  ;;  %v1044_v1 = vpack.c.bf16 %v1758_v48, %v1760_v53  ;;  %v1762_v25 = vpop.eup %1761  ;;  %1773 = vpow2.f32 %v670_v26  ;;  %v831_v53 = vld [vmem:[#allocation3 + $0x8] sm:$0xff]  ;;  %v834_v26 = vld [vmem:[#allocation3 + $0x20] sm:$0xff] }
 0x268   : > { %1775 = vpow2.f32 %v678_v40 }
 0x269   : > { %1677 = vmatmul.mubr.bf16.gmra.mrb[8].mxu1 %v1044_v1  ;;  %1777 = vpow2.f32 %v676_v63 }
 0x26a   : > { %v1764_v4 = vpop.eup %1763  ;;  %1779 = vpow2.f32 %v682_v58 }
 0x26b   : > { %880 = vadd.xlane.f32.xlu1 %v1754_v21  ;;  %878 = vadd.xlane.f32.xlu0 %v1756_v23  ;;  %v1045_v51 = vpack.c.bf16 %v1762_v25, %v1764_v4  ;;  %v1766_v43 = vpop.eup %1765  ;;  %1781 = vpow2.f32 %v680_v60  ;;  %v837_v60 = vld [vmem:[#allocation3 + $0x38] sm:$0xff] }
 0x26c   : > { %1783 = vpow2.f32 %v686_v61 }
 0x26d   : > { %1680 = vmatprep.mubr.bf16.mxu1 %v1045_v51  ;;  %1785 = vpow2.f32 %v684_v7  ;;  %v835_v7 = vld [vmem:[#allocation3 + $0x28] sm:$0xff] }
 0x26e   : > { %v1768_v19 = vpop.eup %1767  ;;  %1787 = vpow2.f32 %v690_v18 }
 0x26f   : > { %892 = vadd.xlane.f32.xlu1 %v1766_v43  ;;  %886 = vadd.xlane.f32.xlu0 %v1764_v4  ;;  %v1046_v57 = vpack.c.bf16 %v1766_v43, %v1768_v19  ;;  %v2247_v62 = vpop.eup %1769  ;;  %1789 = vpow2.f32 %v688_v27 }
 0x270   : > { %v1772_v9 = vpop.eup %1771  ;;  %1791 = vpow2.f32 %v694_v14  ;;  %v847_v4 = vmul.f32 %v2247_v62, %v831_v53 }
 0x271   : > { %1681 = vmatmul.mubr.bf16.gmra.mrb[12].mxu1 %v1046_v57  ;;  %v1774_v12 = vpop.eup %1773  ;;  %1793 = vpow2.f32 %v692_v59  ;;  %v848_v54 = vmul.f32 %v1772_v9, %v832_v52  ;;  %v842_v52 = vld [vmem:[#allocation3 + $0x60] sm:$0xff] }
 0x272   : > { %v2262_v28 = vpop.eup %1775  ;;  %1795 = vpow2.f32 %v698_v0  ;;  %v846_v30 = vmul.f32 %v1774_v12, %v830_v38  ;;  %v839_v0 = vld [vmem:[#allocation3 + $0x48] sm:$0xff]  ;;  %v845_v38 = vld [vmem:[#allocation3 + $0x78] sm:$0xff] }
 0x273   : > { %888 = vadd.xlane.f32.xlu1 %v1762_v25  ;;  %890 = vadd.xlane.f32.xlu0 %v1768_v19  ;;  %v1778_v41 = vpop.eup %1777  ;;  %1797 = vpow2.f32 %v696_v24  ;;  %v836_v19 = vld [vmem:[#allocation3 + $0x30] sm:$0xff]  ;;  %v850_v31 = vmul.f32 %v2262_v28, %v834_v26 }
 0x274   : > { %v1780_v36 = vpop.eup %1779  ;;  %1799 = vpow2.f32 %v700_v37  ;;  %v849_v48 = vmul.f32 %v1778_v41, %v833_v49 }
 0x275   : > { %v2271_v39 = vpop.eup %1781  ;;  %v852_v32 = vmul.f32 %v1780_v36, %v836_v19 }
 0x276   : > { %v2280_v33 = vpop.eup %1783  ;;  %v851_v18 = vmul.f32 %v2271_v39, %v835_v7 }
 0x277   : > { %v2282_v35 = vpop.eup %1785  ;;  %v854_v44 = vmul.f32 %v2280_v33, %v838_v50 }
 0x278   : > { %v2289_v16 = vpop.eup %1787  ;;  %v853_v5 = vmul.f32 %v2282_v35, %v837_v60 }
 0x279   : > { %v2291_v17 = vpop.eup %1789 }
 0x27a   : > { %v2295_v46 = vpop.eup %1791  ;;  %v855_v37 = vmul.f32 %v2291_v17, %v839_v0 }
 0x27b   : > { %v2297_v20 = vpop.eup %1793 }
 0x27c   : > { %v2301_v11 = vpop.eup %1795 }
 0x27d   : > { %v2303_v29 = vpop.eup %1797 }
 0x27e   : > { %v2307_v13 = vpop.eup %1799 }
 0x284   : > { %950 = vperm.xlu1 %1712, %v2247_v62  }
 0x288   : > { %955 = vperm.xlu1 %1712, %v1772_v9  }
 0x289   : > { %945 = vperm.xlu0 %1711, %v1774_v12  }
 0x28c   : > { %965 = vperm.xlu1 %1712, %v2262_v28   ;;  %v840_v28 = vld [vmem:[#allocation3 + $0x50] sm:$0xff] }
 0x28d   : > { %960 = vperm.xlu0 %1711, %v1778_v41   ;;  %v841_v41 = vld [vmem:[#allocation3 + $0x58] sm:$0xff]  ;;  %v856_v14 = vmul.f32 %v2289_v16, %v840_v28 }
 0x28e   : > { %v857_v45 = vmul.f32 %v2297_v20, %v841_v41 }
 0x290   : > { %975 = vperm.xlu1 %1712, %v1780_v36  }
 0x291   : > { %970 = vperm.xlu0 %1711, %v2271_v39  }
 0x294   : > { %985 = vperm.xlu1 %1712, %v2280_v33   ;;  %v861_v33 = vmul.f32 %v2307_v13, %v845_v38 }
 0x295   : > { %980 = vperm.xlu0 %1711, %v2282_v35  }
 0x298   : > { %995 = vperm.xlu1 %1712, %v2289_v16  }
 0x299   : > { %990 = vperm.xlu0 %1711, %v2291_v17  }
 0x29c   : > { %1005 = vperm.xlu1 %1712, %v2295_v46  }
 0x29d   : > { %1000 = vperm.xlu0 %1711, %v2297_v20  }
 0x2a0   : > { %1015 = vperm.xlu1 %1712, %v2301_v11  }
 0x2a1   : > { %1010 = vperm.xlu0 %1711, %v2303_v29  }
 0x2a5   : > { %1020 = vperm.xlu0 %1711, %v2307_v13  }
 0x2d3   : > { %v867_v42 = vpop.xlane.xlu0 %866 }
 0x2d4   : > { %v896_v21 = vadd.f32 %v867_v42, %v848_v54  ;;  %v863_v23 = vpop.xlane.xlu1 %862 }
 0x2d5   : > { %v894_v34 = vadd.f32 %v863_v23, %v846_v30  ;;  %v858_v23 = vmul.f32 %v2295_v46, %v842_v52 }
 0x2d6   : > { %913 = vst.msk [vmem:[#allocation3 + $0x10] sm:$0xff] %vm294_vm0, %v896_v21 }
 0x2d7   : > { %911 = vst.msk [vmem:[#allocation3] sm:$0xff] %vm294_vm0, %v894_v34  ;;  %v844_v34 = vld [vmem:[#allocation3 + $0x70] sm:$0xff] }
 0x2d8   : > { %v869_v1 = vpop.xlane.xlu1 %868 }
 0x2d9   : > { %v897_v25 = vadd.f32 %v869_v1, %v849_v48  ;;  %v843_v48 = vld [vmem:[#allocation3 + $0x68] sm:$0xff] }
 0x2db   : > { %914 = vst.msk [vmem:[#allocation3 + $0x18] sm:$0xff] %vm294_vm0, %v897_v25  ;;  %v865_v51 = vpop.xlane.xlu0 %864 }
 0x2dc   : > { %v895_v43 = vadd.f32 %v865_v51, %v847_v4  ;;  %v860_v51 = vmul.f32 %v2301_v11, %v844_v34 }
 0x2dd   : > { %v1277_v57 = vld [vmem:[#allocation3 + $0x10] sm:$0xff] }
 0x2de   : > { %912 = vst.msk [vmem:[#allocation3 + $0x8] sm:$0xff] %vm294_vm0, %v895_v43  ;;  %1801 = vrcp.f32 %v1277_v57  ;;  %v1275_v8 = vld [vmem:[#allocation3] sm:$0xff]  ;;  %v859_v43 = vmul.f32 %v2303_v29, %v843_v48 }
 0x2df   : > { %1803 = vrcp.f32 %v1275_v8 }
 0x2e0   : > { %v875_v47 = vpop.xlane.xlu0 %874 }
 0x2e1   : > { %v900_v6 = vadd.f32 %v875_v47, %v852_v32 }
 0x2e2   : > { %v1278_v40 = vld [vmem:[#allocation3 + $0x18] sm:$0xff] }
 0x2e3   : > { %917 = vst.msk [vmem:[#allocation3 + $0x30] sm:$0xff] %vm294_vm0, %v900_v6  ;;  %1805 = vrcp.f32 %v1278_v40 }
 0x2e4   : > { %v871_v63 = vpop.xlane.xlu0 %870 }
 0x2e5   : > { %v898_v55 = vadd.f32 %v871_v63, %v850_v31  ;;  %v1276_v58 = vld [vmem:[#allocation3 + $0x8] sm:$0xff] }
 0x2e6   : > { %1807 = vrcp.f32 %v1276_v58 }
 0x2e7   : > { %915 = vst.msk [vmem:[#allocation3 + $0x20] sm:$0xff] %vm294_vm0, %v898_v55 }
 0x2e8   : > { %v1802_v56 = vpop.eup %1801 }
 0x2e9   : > { %1319 = vperm.xlu1 %1712, %v1802_v56   ;;  %v1804_v61 = vpop.eup %1803 }
 0x2ea   : > { %v1281_v62 = vld [vmem:[#allocation3 + $0x30] sm:$0xff] }
 0x2eb   : > { %1809 = vrcp.f32 %v1281_v62 }
 0x2ec   : > { %v877_v3 = vpop.xlane.xlu1 %876 }
 0x2ed   : > { %v1806_v9 = vpop.eup %1805  ;;  %v901_v12 = vadd.f32 %v877_v3, %v853_v5  ;;  %1309 = vperm.xlu1 %1712, %v1804_v61  }
 0x2ee   : > { %1324 = vperm.xlu0 %1711, %v1806_v9   ;;  %v1279_v15 = vld [vmem:[#allocation3 + $0x20] sm:$0xff] }
 0x2ef   : > { %918 = vst.msk [vmem:[#allocation3 + $0x38] sm:$0xff] %vm294_vm0, %v901_v12  ;;  %1811 = vrcp.f32 %v1279_v15 }
 0x2f0   : > { %v1808_v22 = vpop.eup %1807  ;;  %v873_v27 = vpop.xlane.xlu1 %872 }
 0x2f1   : > { %v899_v10 = vadd.f32 %v873_v27, %v851_v18 }
 0x2f2   : > { %1314 = vperm.xlu0 %1711, %v1808_v22  }
 0x2f3   : > { %916 = vst.msk [vmem:[#allocation3 + $0x28] sm:$0xff] %vm294_vm0, %v899_v10 }
 0x2f4   : > { %v883_v59 = vpop.xlane.xlu0 %882  ;;  %v885_v36 = vpop.xlane.xlu1 %884 }
 0x2f5   : > { %v1810_v2 = vpop.eup %1809  ;;  %v904_v24 = vadd.f32 %v883_v59, %v856_v14  ;;  %v905_v39 = vadd.f32 %v885_v36, %v857_v45 }
 0x2f6   : > { %1339 = vperm.xlu1 %1712, %v1810_v2   ;;  %v1282_v35 = vld [vmem:[#allocation3 + $0x38] sm:$0xff] }
 0x2f7   : > { %921 = vst.msk [vmem:[#allocation3 + $0x50] sm:$0xff] %vm294_vm0, %v904_v24  ;;  %922 = vst.msk [vmem:[#allocation3 + $0x58] sm:$0xff] %vm294_vm0, %v905_v39  ;;  %1813 = vrcp.f32 %v1282_v35 }
 0x2f8   : > { %v879_v16 = vpop.xlane.xlu0 %878  ;;  %v881_v20 = vpop.xlane.xlu1 %880 }
 0x2f9   : > { %v1812_v54 = vpop.eup %1811  ;;  %v902_v42 = vadd.f32 %v879_v16, %v854_v44  ;;  %v903_v30 = vadd.f32 %v881_v20, %v855_v37 }
 0x2fa   : > { %1329 = vperm.xlu1 %1712, %v1812_v54   ;;  %v1280_v21 = vld [vmem:[#allocation3 + $0x28] sm:$0xff] }
 0x2fb   : > { %919 = vst.msk [vmem:[#allocation3 + $0x40] sm:$0xff] %vm294_vm0, %v902_v42  ;;  %920 = vst.msk [vmem:[#allocation3 + $0x48] sm:$0xff] %vm294_vm0, %v903_v30  ;;  %1815 = vrcp.f32 %v1280_v21 }
 0x2fc   : > { %v887_v17 = vpop.xlane.xlu0 %886  ;;  %v893_v49 = vpop.xlane.xlu1 %892 }
 0x2fd   : > { %v906_v53 = vadd.f32 %v887_v17, %v858_v23  ;;  %v909_v1 = vadd.f32 %v893_v49, %v861_v33 }
 0x2fe   : > { %v1285_v25 = vld [vmem:[#allocation3 + $0x50] sm:$0xff]  ;;  %v1286_v4 = vld [vmem:[#allocation3 + $0x58] sm:$0xff] }
 0x2ff   : > { %923 = vst.msk [vmem:[#allocation3 + $0x60] sm:$0xff] %vm294_vm0, %v906_v53  ;;  %926 = vst.msk [vmem:[#allocation3 + $0x78] sm:$0xff] %vm294_vm0, %v909_v1  ;;  %1817 = vrcp.f32 %v1285_v25 }
 0x300   : > { %v891_v46 = vpop.xlane.xlu0 %890  ;;  %v889_v13 = vpop.xlane.xlu1 %888  ;;  %1819 = vrcp.f32 %v1286_v4 }
 0x301   : > { %v1814_v19 = vpop.eup %1813  ;;  %v908_v57 = vadd.f32 %v891_v46, %v860_v51  ;;  %v907_v32 = vadd.f32 %v889_v13, %v859_v43 }
 0x302   : > { %1344 = vperm.xlu0 %1711, %v1814_v19   ;;  %v1283_v8 = vld [vmem:[#allocation3 + $0x40] sm:$0xff]  ;;  %v1284_v47 = vld [vmem:[#allocation3 + $0x48] sm:$0xff] }
 0x303   : > { %925 = vst.msk [vmem:[#allocation3 + $0x70] sm:$0xff] %vm294_vm0, %v908_v57  ;;  %924 = vst.msk [vmem:[#allocation3 + $0x68] sm:$0xff] %vm294_vm0, %v907_v32  ;;  %1821 = vrcp.f32 %v1283_v8 }
 0x304   : > { %1823 = vrcp.f32 %v1284_v47  ;;  %v951_v27 = vpop.permute.xlu1 %950 }
 0x305   : > { %v1816_v26 = vpop.eup %1815  ;;  %v1024_v43 = vmul.f32 0.0, %v951_v27 }
 0x306   : > { %1334 = vperm.xlu0 %1711, %v1816_v26   ;;  %v1287_v11 = vld [vmem:[#allocation3 + $0x60] sm:$0xff]  ;;  %v1290_v55 = vld [vmem:[#allocation3 + $0x78] sm:$0xff] }
 0x307   : > { %1825 = vrcp.f32 %v1287_v11 }
 0x308   : > { %v946_v14 = vpop.permute.xlu0 %945  ;;  %v956_v59 = vpop.permute.xlu1 %955 }
 0x309   : > { %v1818_v29 = vpop.eup %1817  ;;  %v1025_v21 = vmul.f32 0.0, %v956_v59  ;;  %v1023_v17 = vmul.f32 0.0, %v946_v14 }
 0x30a   : > { %v1820_v6 = vpop.eup %1819  ;;  %1359 = vperm.xlu1 %1712, %v1818_v29   ;;  %v1289_v40 = vld [vmem:[#allocation3 + $0x70] sm:$0xff]  ;;  %v1288_v31 = vld [vmem:[#allocation3 + $0x68] sm:$0xff] }
 0x30b   : > { %1364 = vperm.xlu0 %1711, %v1820_v6   ;;  %1827 = vrcp.f32 %v1289_v40 }
 0x30c   : > { %1829 = vrcp.f32 %v1288_v31  ;;  %v961_v50 = vpop.permute.xlu0 %960  ;;  %v966_v2 = vpop.permute.xlu1 %965 }
 0x30d   : > { %v1822_v63 = vpop.eup %1821  ;;  %1831 = vrcp.f32 %v1290_v55  ;;  %v1026_v48 = vmul.f32 0.0, %v961_v50  ;;  %v1027_v26 = vmul.f32 0.0, %v966_v2 }
 0x30e   : > { %v1824_v58 = vpop.eup %1823  ;;  %1349 = vperm.xlu1 %1712, %v1822_v63  }
 0x30f   : > { %1354 = vperm.xlu0 %1711, %v1824_v58  }
 0x310   : > { %v971_v35 = vpop.permute.xlu0 %970  ;;  %v976_v44 = vpop.permute.xlu1 %975 }
 0x311   : > { %v1826_v56 = vpop.eup %1825  ;;  %v1029_v57 = vmul.f32 0.0, %v976_v44  ;;  %v1028_v58 = vmul.f32 0.0, %v971_v35 }
 0x312   : > { %1369 = vperm.xlu1 %1712, %v1826_v56  }
 0x314   : > { %v981_v37 = vpop.permute.xlu0 %980  ;;  %v986_v16 = vpop.permute.xlu1 %985 }
 0x315   : > { %v1828_v60 = vpop.eup %1827  ;;  %v1030_v31 = vmul.f32 0.0, %v981_v37 }
 0x316   : > { %v1830_v62 = vpop.eup %1829  ;;  %1379 = vperm.xlu1 %1712, %v1828_v60  }
 0x317   : > { %1374 = vperm.xlu0 %1711, %v1830_v62   ;;  %v1832_v5 = vpop.eup %1831 }
 0x318   : > { %v991_v20 = vpop.permute.xlu0 %990  ;;  %v996_v52 = vpop.permute.xlu1 %995 }
 0x319   : > { %v1032_v14 = vmul.f32 0.0, %v991_v20 }
 0x31b   : > { %1384 = vperm.xlu0 %1711, %v1832_v5   ;;  %v1033_v5 = vmul.f32 0.0, %v996_v52 }
 0x31c   : > { %v1001_v38 = vpop.permute.xlu0 %1000  ;;  %v1006_v54 = vpop.permute.xlu1 %1005 }
 0x320   : > { %v2354_v42 = vpop.permute.xlu0 %1010  ;;  %v2356_v30 = vpop.permute.xlu1 %1015 }
 0x321   : > { %v1037_v20 = vmul.f32 0.0, %v2356_v30  ;;  %v1036_v52 = vmul.f32 0.0, %v2354_v42 }
 0x324   : > { %v1670_v61 = vpop.f32.mrb[0].mxu1  ;;  %v2364_v49 = vpop.permute.xlu0 %1020 }
 0x325   : > { %v1145_v3 = vpop.f32.mrb[1].mxu1  ;;  %v1210_v23 = vadd.f32 %v1670_v61, %v1025_v21 }
 0x326   : > { %v1671_v7 = vpop.f32.mrb[2].mxu1  ;;  %v1208_v53 = vadd.f32 %v1145_v3, %v1023_v17  ;;  %v1034_v3 = vmul.f32 0.0, %v1001_v38 }
 0x327   : > { %v1148_v9 = vpop.f32.mrb[3].mxu1  ;;  %v1211_v1 = vadd.f32 %v1671_v7, %v1026_v48 }
 0x328   : > { %v1209_v13 = vadd.f32 %v1148_v9, %v1024_v43 }
 0x334   : > { %v1674_v12 = vpop.f32.mrb[4].mxu1 }
 0x335   : > { %v1161_v15 = vpop.f32.mrb[5].mxu1  ;;  %v1214_v8 = vadd.f32 %v1674_v12, %v1029_v57 }
 0x336   : > { %v1675_v18 = vpop.f32.mrb[6].mxu1  ;;  %v1212_v29 = vadd.f32 %v1161_v15, %v1027_v26  ;;  %v1031_v15 = vmul.f32 0.0, %v986_v16 }
 0x337   : > { %v1164_v22 = vpop.f32.mrb[7].mxu1  ;;  %v1215_v63 = vadd.f32 %v1675_v18, %v1030_v31 }
 0x338   : > { %v1213_v60 = vadd.f32 %v1164_v22, %v1028_v58 }
 0x33c   : > { %v2338_v28 = vpop.f32.mrb[8].mxu1 }
 0x33d   : > { %v2340_v41 = vpop.f32.mrb[9].mxu1  ;;  %v1218_v7 = vadd.f32 %v2338_v28, %v1033_v5  ;;  %v1035_v28 = vmul.f32 0.0, %v1006_v54 }
 0x33e   : > { %v2342_v10 = vpop.f32.mrb[10].mxu1  ;;  %v1216_v59 = vadd.f32 %v2340_v41, %v1031_v15 }
 0x33f   : > { %v2344_v45 = vpop.f32.mrb[11].mxu1  ;;  %v1219_v9 = vadd.f32 %v2342_v10, %v1034_v3 }
 0x340   : > { %v1217_v50 = vadd.f32 %v2344_v45, %v1032_v14 }
 0x344   : > { %v2346_v36 = vpop.f32.mrb[12].mxu1 }
 0x345   : > { %v2348_v0 = vpop.f32.mrb[13].mxu1  ;;  %v1222_v45 = vadd.f32 %v2346_v36, %v1037_v20 }
 0x346   : > { %v2350_v24 = vpop.f32.mrb[14].mxu1  ;;  %v1220_v37 = vadd.f32 %v2348_v0, %v1035_v28  ;;  %v1038_v0 = vmul.f32 0.0, %v2364_v49 }
 0x347   : > { %v2352_v39 = vpop.f32.mrb[15].mxu1 }
 0x348   : > { %v1221_v38 = vadd.f32 %v2352_v39, %v1036_v52  ;;  %v1223_v17 = vadd.f32 %v2350_v24, %v1038_v0 }
 0x368   : > { %v1320_v33 = vpop.permute.xlu1 %1319 }
 0x369   : > { %v1389_v34 = vmul.f32 %v1320_v33, %v1210_v23 }
 0x36b   : > { %1405 = vst [vmem:[%s2362_s29 + $0x10] sm:$0xff] %v1389_v34 }
 0x36c   : > { %v1310_v25 = vpop.permute.xlu1 %1309 }
 0x36d   : > { %v1387_v4 = vmul.f32 %v1310_v25, %v1208_v53  ;;  %v1325_v51 = vpop.permute.xlu0 %1324 }
 0x36e   : > { %v1390_v46 = vmul.f32 %v1325_v51, %v1211_v1 }
 0x36f   : > { %1403 = vst [vmem:[%s2362_s29] sm:$0xff] %v1387_v4 }
 0x370   : > { %1406 = vst [vmem:[%s2362_s29 + $0x18] sm:$0xff] %v1390_v46 }
 0x371   : > { %v1315_v19 = vpop.permute.xlu0 %1314 }
 0x372   : > { %v1388_v32 = vmul.f32 %v1315_v19, %v1209_v13 }
 0x374   : > { %1404 = vst [vmem:[%s2362_s29 + $0x8] sm:$0xff] %v1388_v32 }
 0x375   : > { %v1340_v47 = vpop.permute.xlu1 %1339 }
 0x376   : > { %v1393_v11 = vmul.f32 %v1340_v47, %v1214_v8 }
 0x378   : > { %1409 = vst [vmem:[%s2362_s29 + $0x30] sm:$0xff] %v1393_v11 }
 0x379   : > { %v1330_v6 = vpop.permute.xlu1 %1329 }
 0x37a   : > { %v1391_v40 = vmul.f32 %v1330_v6, %v1212_v29 }
 0x37c   : > { %1407 = vst [vmem:[%s2362_s29 + $0x20] sm:$0xff] %v1391_v40 }
 0x381   : > { %v1345_v55 = vpop.permute.xlu0 %1344 }
 0x382   : > { %v1394_v56 = vmul.f32 %v1345_v55, %v1215_v63 }
 0x384   : > { %1410 = vst [vmem:[%s2362_s29 + $0x38] sm:$0xff] %v1394_v56 }
 0x385   : > { %v1335_v62 = vpop.permute.xlu0 %1334 }
 0x386   : > { %v1392_v61 = vmul.f32 %v1335_v62, %v1213_v60 }
 0x388   : > { %1408 = vst [vmem:[%s2362_s29 + $0x28] sm:$0xff] %v1392_v61 }
 0x389   : > { %v1360_v12 = vpop.permute.xlu1 %1359 }
 0x38a   : > { %v1365_v18 = vpop.permute.xlu0 %1364  ;;  %v1397_v27 = vmul.f32 %v1360_v12, %v1218_v7 }
 0x38b   : > { %v1398_v22 = vmul.f32 %v1365_v18, %v1219_v9 }
 0x38c   : > { %1413 = vst [vmem:[%s2362_s29 + $0x50] sm:$0xff] %v1397_v27 }
 0x38d   : > { %1414 = vst [vmem:[%s2362_s29 + $0x58] sm:$0xff] %v1398_v22  ;;  %v1350_v2 = vpop.permute.xlu1 %1349 }
 0x38e   : > { %v1355_v35 = vpop.permute.xlu0 %1354  ;;  %v1395_v44 = vmul.f32 %v1350_v2, %v1216_v59 }
 0x38f   : > { %v1396_v10 = vmul.f32 %v1355_v35, %v1217_v50 }
 0x390   : > { %1411 = vst [vmem:[%s2362_s29 + $0x40] sm:$0xff] %v1395_v44 }
 0x391   : > { %1412 = vst [vmem:[%s2362_s29 + $0x48] sm:$0xff] %v1396_v10  ;;  %v1370_v16 = vpop.permute.xlu1 %1369 }
 0x392   : > { %v1399_v41 = vmul.f32 %v1370_v16, %v1220_v37 }
 0x394   : > { %1415 = vst [vmem:[%s2362_s29 + $0x60] sm:$0xff] %v1399_v41 }
 0x395   : > { %v1380_v54 = vpop.permute.xlu1 %1379 }
 0x396   : > { %v1375_v21 = vpop.permute.xlu0 %1374  ;;  %v1401_v23 = vmul.f32 %v1380_v54, %v1222_v45 }
 0x397   : > { %v1400_v33 = vmul.f32 %v1375_v21, %v1221_v38 }
 0x398   : > { %1417 = vst [vmem:[%s2362_s29 + $0x70] sm:$0xff] %v1401_v23 }
 0x399   : > { %1416 = vst [vmem:[%s2362_s29 + $0x68] sm:$0xff] %v1400_v33 }
 0x39a   : > { %v1385_v30 = vpop.permute.xlu0 %1384 }
 0x39b   : > { %v1402_v34 = vmul.f32 %v1385_v30, %v1223_v17 }
 0x39d   : > { %1418 = vst [vmem:[%s2362_s29 + $0x78] sm:$0xff] %v1402_v34 }
 0x39e PF: > { %s13_s14 = sadd.s32 1, %s1855_s14   ;;  %s2420_s12 = smov %s1851_s13 }
 0x39f   : > { %p10_p5 = scmp.ge.s32.totalorder %s13_s14, 4   ;;  %s2421_s13 = smov %s2423_s15 }
 0x3a1   :  { %12 = sbr.rel (!%p10_p5) target bundleno = 2 (0x2), region = 76 }

</bundles_post_ra>
